<compile_context>
chip_gen: v7x
topology: tpu7x:2x2x1
jax: 0.10.0
libtpu: 0.0.40
codegen_flags: <defaults>
</compile_context>

<pallas_src>
import jax
import jax.numpy as jnp
import numpy as np
from jax.experimental import pallas as pl
from jax.experimental.pallas import tpu as pltpu


def _make_conv_bn_act_kernel(k, ho, stride):
    """Kernel for one image: k accumulated matmuls + BN shift + SiLU."""

    def kernel(x_ref, w_ref, shift_ref, o_ref):
        # x_ref:     (Hp, Wp*Cin)       padded image, batch dim squeezed
        # w_ref:     (k, Wp*Cin, Wo*Cout) BN-scale-folded wide weight
        # shift_ref: (1, Wo*Cout)        BN shift tiled along Wo
        # o_ref:     (Ho, Wo*Cout)       lane-dense output slab
        def rows(di):
            if stride == 1:
                return x_ref[pl.ds(di, ho), :]
            return x_ref[pl.ds(di, ho, stride=stride), :]

        acc = jnp.dot(rows(0), w_ref[0], preferred_element_type=jnp.float32)
        for di in range(1, k):
            acc += jnp.dot(rows(di), w_ref[di],
                           preferred_element_type=jnp.float32)

        y = acc + shift_ref[...]                       # folded BatchNorm (eval)
        # SiLU: reciprocal goes to the EUP slot (free alongside VPU work).
        o_ref[...] = y * pl.reciprocal(1.0 + jnp.exp(-y), approx=True)

    return kernel


def conv_bn_act(x_nchw, weight_oihw, gamma, beta, run_mean, run_var,
                *, stride=1, eps=1e-5):
    """ConvBNAct forward.  x: (N, Cin, H, W) f32, weight: (Cout, Cin, k, k)."""
    n, cin, h, w = x_nchw.shape
    cout, cin_w, k, _ = weight_oihw.shape
    assert cin_w == cin, "groups=1 instantiation"  # TODO(synk): groups > 1
    pad = (k - 1) // 2
    ho = (h + 2 * pad - k) // stride + 1
    wo = (w + 2 * pad - k) // stride + 1
    hp, wp = h + 2 * pad, w + 2 * pad

    # ---- glue (plain JAX): layout, padding, BN folding, wide weight -------
    x_nhwc = jnp.transpose(x_nchw, (0, 2, 3, 1)).astype(jnp.float32)
    xp = jnp.pad(x_nhwc, ((0, 0), (pad, pad), (pad, pad), (0, 0)))
    x_rows = xp.reshape(n, hp, wp * cin)          # row index h', lane = w'*Cin+c

    scale = (gamma / jnp.sqrt(run_var + eps)).astype(jnp.float32)   # (Cout,)
    shift = (beta - run_mean * scale).astype(jnp.float32)           # (Cout,)

    # BN scale folded into the conv weight; build the wide weight matrix:
    #   wbig[di, w'*Cin + c, j*Cout + o] = w_t[di, w' - j*stride, c, o]
    w_f = weight_oihw.astype(jnp.float32) * scale[:, None, None, None]
    w_t = jnp.transpose(w_f, (2, 3, 1, 0))                    # (k, k, Cin, Cout)
    wprime = jnp.arange(wp)[:, None]                          # (Wp, 1)
    jcols = jnp.arange(wo)[None, :]                           # (1, Wo)
    dj = wprime - stride * jcols                              # (Wp, Wo)
    valid = (dj >= 0) & (dj < k)
    djc = jnp.clip(dj, 0, k - 1)
    gathered = w_t[:, djc]                                    # (k, Wp, Wo, Cin, Cout)
    gathered = jnp.where(valid[None, :, :, None, None], gathered, 0.0)
    wbig = jnp.transpose(gathered, (0, 1, 3, 2, 4)).reshape(k, wp * cin, wo * cout)

    shift_row = jnp.tile(shift, wo).reshape(1, wo * cout)     # col = j*Cout + o

    # ---- hot path: Pallas kernel, one image per (parallel) grid step ------
    kernel = _make_conv_bn_act_kernel(k, ho, stride)
    out = pl.pallas_call(
        kernel,
        out_shape=jax.ShapeDtypeStruct((n, ho, wo * cout), jnp.float32),
        grid_spec=pltpu.PrefetchScalarGridSpec(
            num_scalar_prefetch=0,
            grid=(n,),
            in_specs=[
                pl.BlockSpec((None, hp, wp * cin), lambda b: (b, 0, 0)),
                pl.BlockSpec((k, wp * cin, wo * cout), lambda b: (0, 0, 0)),
                pl.BlockSpec((1, wo * cout), lambda b: (0, 0)),
            ],
            out_specs=pl.BlockSpec((None, ho, wo * cout), lambda b: (b, 0, 0)),
        ),
        compiler_params=pltpu.CompilerParams(
            dimension_semantics=("parallel",)),
    )(x_rows, wbig, shift_row)

    # lane-dense slab -> NCHW
    out = out.reshape(n, ho, wo, cout)
    return jnp.transpose(out, (0, 3, 1, 2))


def _reference(x_nchw, weight_oihw, gamma, beta, run_mean, run_var,
               *, stride=1, eps=1e-5):
    k = weight_oihw.shape[-1]
    pad = (k - 1) // 2
    y = jax.lax.conv_general_dilated(
        x_nchw, weight_oihw, window_strides=(stride, stride),
        padding=((pad, pad), (pad, pad)),
        dimension_numbers=("NCHW", "OIHW", "NCHW"))
    scale = gamma / jnp.sqrt(run_var + eps)
    shift = beta - run_mean * scale
    y = y * scale[None, :, None, None] + shift[None, :, None, None]
    return y * jax.nn.sigmoid(y)


if __name__ == "__main__":
    # ConvBNAct(in_channel=4, out_channel=8, kernel_size=3, stride=1, groups=1,
    #           norm_layer=BatchNorm2d, act_layer=SiLU)
    N, Cin, H, W = 2, 4, 16, 16
    Cout, K = 8, 3

    key = jax.random.PRNGKey(0)
    kx, kw, kg, kb, km, kv = jax.random.split(key, 6)

    x = jax.random.normal(kx, (N, Cin, H, W), dtype=jnp.float32)
    # Kaiming-uniform-ish deterministic init for the conv weight (bias=False)
    fan_in = Cin * K * K
    bound = 1.0 / np.sqrt(fan_in)
    weight = jax.random.uniform(kw, (Cout, Cin, K, K), dtype=jnp.float32,
                                minval=-bound, maxval=bound)
    # BatchNorm parameters / running stats (non-trivial, deterministic)
    gamma = 1.0 + 0.1 * jax.random.normal(kg, (Cout,), dtype=jnp.float32)
    beta = 0.1 * jax.random.normal(kb, (Cout,), dtype=jnp.float32)
    run_mean = 0.1 * jax.random.normal(km, (Cout,), dtype=jnp.float32)
    run_var = jnp.abs(1.0 + 0.1 * jax.random.normal(kv, (Cout,), dtype=jnp.float32))

    out = conv_bn_act(x, weight, gamma, beta, run_mean, run_var, stride=1)
    out = jax.block_until_ready(out)

    ref = jax.block_until_ready(
        _reference(x, weight, gamma, beta, run_mean, run_var, stride=1))

    assert out.shape == (N, Cout, H, W), out.shape
    # rtol slightly above exact-f32 to cover the EUP approximate reciprocal in SiLU.
    np.testing.assert_allclose(np.asarray(out), np.asarray(ref),
                               atol=2e-3, rtol=5e-3)
    print("KERNEL_OK")
</pallas_src>

<mosaic_0001>
module attributes {stable_mosaic.version = 11 : i64} {
  func.func @kernel(%arg0: i32, %arg1: memref<1x18x72xf32, #tpu.memory_space<vmem>>, %arg2: memref<3x72x128xf32, #tpu.memory_space<vmem>>, %arg3: memref<1x128xf32, #tpu.memory_space<vmem>>, %arg4: memref<1x16x128xf32, #tpu.memory_space<vmem>>) attributes {dimension_semantics = [#tpu.dimension_semantics<parallel>], iteration_bounds = array<i64: 2>, scalar_prefetch = 0 : i64, scratch_operands = 0 : i64, tpu.core_type = #tpu.core_type<tc>, window_params = [{transform_indices = @transform_0, window_bounds = array<i64: 1, 18, 72>}, {pipeline_mode = #tpu.pipeline_mode<synchronous>, transform_indices = @transform_1, window_bounds = array<i64: 3, 72, 128>}, {pipeline_mode = #tpu.pipeline_mode<synchronous>, transform_indices = @transform_2, window_bounds = array<i64: 1, 128>}, {transform_indices = @transform_3, window_bounds = array<i64: 1, 16, 128>}]} {
    %c0 = arith.constant 0 : index
    %c0_0 = arith.constant 0 : index
    %c0_1 = arith.constant 0 : index
    %0 = vector.load %arg1[%c0, %c0_0, %c0_1] : memref<1x18x72xf32, #tpu.memory_space<vmem>>, vector<1x16x72xf32>
    %1 = vector.shape_cast %0 : vector<1x16x72xf32> to vector<16x72xf32>
    %c0_2 = arith.constant 0 : index
    %c0_3 = arith.constant 0 : index
    %c0_4 = arith.constant 0 : index
    %2 = vector.load %arg2[%c0_2, %c0_3, %c0_4] : memref<3x72x128xf32, #tpu.memory_space<vmem>>, vector<1x72x128xf32>
    %3 = vector.shape_cast %2 : vector<1x72x128xf32> to vector<72x128xf32>
    %cst = arith.constant dense<0.000000e+00> : vector<16x128xf32>
    %4 = tpu.matmul %1, %3, %cst {dimension_numbers = #tpu.dot_dimension_numbers<[1], [0], [0], [1], [0, 0, 1, 1], [], []>} : vector<16x72xf32>, vector<72x128xf32>, vector<16x128xf32> -> vector<16x128xf32>
    %c0_5 = arith.constant 0 : index
    %c1 = arith.constant 1 : index
    %c0_6 = arith.constant 0 : index
    %5 = vector.load %arg1[%c0_5, %c1, %c0_6] : memref<1x18x72xf32, #tpu.memory_space<vmem>>, vector<1x16x72xf32>
    %6 = vector.shape_cast %5 : vector<1x16x72xf32> to vector<16x72xf32>
    %c1_7 = arith.constant 1 : index
    %c0_8 = arith.constant 0 : index
    %c0_9 = arith.constant 0 : index
    %7 = vector.load %arg2[%c1_7, %c0_8, %c0_9] : memref<3x72x128xf32, #tpu.memory_space<vmem>>, vector<1x72x128xf32>
    %8 = vector.shape_cast %7 : vector<1x72x128xf32> to vector<72x128xf32>
    %cst_10 = arith.constant dense<0.000000e+00> : vector<16x128xf32>
    %9 = tpu.matmul %6, %8, %cst_10 {dimension_numbers = #tpu.dot_dimension_numbers<[1], [0], [0], [1], [0, 0, 1, 1], [], []>} : vector<16x72xf32>, vector<72x128xf32>, vector<16x128xf32> -> vector<16x128xf32>
    %10 = arith.addf %4, %9 : vector<16x128xf32>
    %c0_11 = arith.constant 0 : index
    %c2 = arith.constant 2 : index
    %c0_12 = arith.constant 0 : index
    %11 = vector.load %arg1[%c0_11, %c2, %c0_12] : memref<1x18x72xf32, #tpu.memory_space<vmem>>, vector<1x16x72xf32>
    %12 = vector.shape_cast %11 : vector<1x16x72xf32> to vector<16x72xf32>
    %c2_13 = arith.constant 2 : index
    %c0_14 = arith.constant 0 : index
    %c0_15 = arith.constant 0 : index
    %13 = vector.load %arg2[%c2_13, %c0_14, %c0_15] : memref<3x72x128xf32, #tpu.memory_space<vmem>>, vector<1x72x128xf32>
    %14 = vector.shape_cast %13 : vector<1x72x128xf32> to vector<72x128xf32>
    %cst_16 = arith.constant dense<0.000000e+00> : vector<16x128xf32>
    %15 = tpu.matmul %12, %14, %cst_16 {dimension_numbers = #tpu.dot_dimension_numbers<[1], [0], [0], [1], [0, 0, 1, 1], [], []>} : vector<16x72xf32>, vector<72x128xf32>, vector<16x128xf32> -> vector<16x128xf32>
    %16 = arith.addf %10, %15 : vector<16x128xf32>
    %c0_17 = arith.constant 0 : index
    %c0_18 = arith.constant 0 : index
    %17 = vector.load %arg3[%c0_17, %c0_18] : memref<1x128xf32, #tpu.memory_space<vmem>>, vector<1x128xf32>
    %18 = vector.broadcast %17 : vector<1x128xf32> to vector<16x128xf32>
    %19 = arith.addf %16, %18 : vector<16x128xf32>
    %cst_19 = arith.constant 0.000000e+00 : f32
    %20 = vector.broadcast %cst_19 : f32 to vector<16x128xf32>
    %21 = arith.subf %20, %19 : vector<16x128xf32>
    %22 = math.exp %21 : vector<16x128xf32>
    %cst_20 = arith.constant 1.000000e+00 : f32
    %23 = vector.broadcast %cst_20 : f32 to vector<16x128xf32>
    %24 = arith.addf %23, %22 : vector<16x128xf32>
    %25 = tpu.reciprocal %24 {approx = true} : vector<16x128xf32> -> vector<16x128xf32>
    %26 = arith.mulf %19, %25 : vector<16x128xf32>
    %c0_21 = arith.constant 0 : index
    %c0_22 = arith.constant 0 : index
    %c0_23 = arith.constant 0 : index
    %27 = vector.load %arg4[%c0_21, %c0_22, %c0_23] : memref<1x16x128xf32, #tpu.memory_space<vmem>>, vector<1x16x128xf32>
    %28 = vector.shape_cast %27 : vector<1x16x128xf32> to vector<16x128xf32>
    %29 = vector.shape_cast %26 : vector<16x128xf32> to vector<1x16x128xf32>
    tpu.vector_store %arg4[%c0_21, %c0_22, %c0_23], %29 {strides = array<i32>} : memref<1x16x128xf32, #tpu.memory_space<vmem>>, vector<1x16x128xf32>,
    return
  }
  func.func @transform_0(%arg0: i32) -> (i32, i32, i32) {
    %c0_i32 = arith.constant 0 : i32
    %c0_i32_0 = arith.constant 0 : i32
    %c0_i32_1 = arith.constant 0 : i32
    return %arg0, %c0_i32, %c0_i32_0 : i32, i32, i32
  }
  func.func @transform_1(%arg0: i32) -> (i32, i32, i32) {
    %c0_i32 = arith.constant 0 : i32
    %c0_i32_0 = arith.constant 0 : i32
    %c0_i32_1 = arith.constant 0 : i32
    %c0_i32_2 = arith.constant 0 : i32
    return %c0_i32, %c0_i32_0, %c0_i32_1 : i32, i32, i32
  }
  func.func @transform_2(%arg0: i32) -> (i32, i32) {
    %c0_i32 = arith.constant 0 : i32
    %c0_i32_0 = arith.constant 0 : i32
    %c0_i32_1 = arith.constant 0 : i32
    return %c0_i32, %c0_i32_0 : i32, i32
  }
  func.func @transform_3(%arg0: i32) -> (i32, i32, i32) {
    %c0_i32 = arith.constant 0 : i32
    %c0_i32_0 = arith.constant 0 : i32
    %c0_i32_1 = arith.constant 0 : i32
    return %arg0, %c0_i32, %c0_i32_0 : i32, i32, i32
  }
}

</mosaic_0001>

<bundles_post_ra>
// kernel: tpu_custom_call.1
= control target key start
LH: loop header
LB: loop body
LE: loop exit
PB: predicated region body
PF: predicated region fallthrough
CT: control target
= control target key end

     0   :  { %8 = vsyncpa [#allocation3], 0  ;;  %s1085_s0 = inlined_call_operand.vmem [shape: f32[2,18,72], index: 0, kind: input, shape index: {}]   ;;  %s1086_s1 = inlined_call_operand.hbm [shape: f32[3,72,128], index: 1, kind: input, shape index: {}]   ;;  %s1087_s2 = inlined_call_operand.vmem [shape: f32[1,128], index: 2, kind: input, shape index: {}]   ;;  %s1088_s3 = inlined_call_operand.hbm [shape: f32[2,16,128], index: 3, kind: output, shape index: {}]  }
   0x1   :  { %9 = vsyncpa [#allocation4], 0 }
   0x2   :  { %11 = vsyncpa [#allocation4 + $0x1], 0  ;;  %s930_s12 = smov 0   ;;  %s932_s13 = smov 0  }
   0x3   :  { %s934_s14 = smov 0   ;;  %s936_s15 = smov 0  }
   0x4 LB: > { %s951_s16 = sadd.s32 4294967295, %s902_s15   ;;  %s576_s17 = sadd.s32 4294967294, %s902_s15   ;;  %s902_s15 = sphi %s936_s15, %s1104_s15   ;;  %s898_s14 = sphi %s934_s14, %s1103_s14   ;;  %s894_s13 = sphi %s932_s13, %s1102_s13   ;;  %s890_s12 = sphi %s930_s12, %s1101_s12  }
   0x5   : > { %s955_s18 = sadd.s32 1, %s902_s15   ;;  %s92_s19 = sadd.s32 1, %s898_s14 }
   0x6   : > { %s89_s20 = ssub.s32 %s902_s15, %s955_s18  ;;  %p102_p0 = scmp.ne.s32.totalorder %s898_s14, %s894_s13 }
   0x7   : > { %p90_p1 = scmp.eq.s32.totalorder %s89_s20, 0  ;;  %p103_p2 = scmp.eq.s32.totalorder %s951_s16, 1 }
   0x8   : > { %p108_p3 = scmp.ne.s32.totalorder %s894_s13, %s890_s12  ;;  %p109_p4 = scmp.eq.s32.totalorder %s576_s17, 1 }
   0x9   : > { %s966_s21 = scalar_select %p90_p1, %s898_s14, %s92_s19  }
   0xa   : > { %p968_p5 = por %p103_p2, %p102_p0  ;;  %p972_p6 = por %p109_p4, %p108_p3 }
   0xb   : > { %p577_p7 = scmp.ge.s32.totalorder %s902_s15, 1  ;;  %p116_p8 = scmp.lt.s32.totalorder %s902_s15, 3 }
   0xc   : > { %s1092_s22 = scalar_select %p968_p5, 1, 0 }
   0xd   : > { %s1093_s23 = scalar_select %p972_p6, 1, 0 }
   0xe   : > { %p1089_p9 = scmp.eq.s32.totalorder %s951_s16, 0  ;;  %p979_p10 = pnand %p577_p7, %p116_p8 }
   0xf   : > { %s904_s25 = smov [#allocation2]   ;;  %s808_s30 = scalar_lea.hbm %s1086_s1, 3456 }
  0x10   : > { %s1094_s24 = scalar_select %p979_p10, 1, 0 }
  0x11   : > { %s128_s26 = sshll.u32 %s904_s25, 4  ;;  %p752_p11 = pneg %p979_p10  ;;  %s129_s26 = int_to_ptr.vmem [resolvable:$true] %s128_s26 }
  0x12   : > { %p809_p13 = scmp.ne.s32.totalorder %s1086_s1, %s808_s30  ;;  %p815_p3 = scmp.lt.u32.totalorder %s808_s30, %s1086_s1 }
  0x13   : > { %p987_p12 = pnand %p1089_p9, %p752_p11 }
  0x15   : > { %p810_p0 = pneg %p987_p12 }
  0x17   : > { %p811_p1 = pnand %p810_p0, %p809_p13 }
  0x19   : > { %p812_p2 = pneg %p811_p1 }
  0x1b   : > { %p817_p4 = pnand %p815_p3, %p812_p2 }
  0x1d   : > { %820 = shalt.err (!%p817_p4)
}
  0x1e   : > { %s821_s8 = scalar_lea.vmem %s129_s26, 3456  ;;  %p829_p9 = scmp.lt.s32.totalorder %s129_s26, %s129_s26 }
  0x1f   : > { %p822_p7 = scmp.ne.s32.totalorder %s129_s26, %s821_s8  ;;  %p830_p6 = scmp.lt.s32.totalorder %s821_s8, %s821_s8 }
  0x21   : > { %p824_p8 = pnand %p822_p7, %p810_p0  ;;  %p831_p5 = por %p830_p6, %p829_p9 }
  0x23   : > { %p825_p11 = pneg %p824_p8 }
  0x25   : > { %p832_p10 = pnand %p831_p5, %p825_p11 }
  0x27   : > { %835 = shalt.err (!%p832_p10)
}
  0x28   : > { %s905_s9 = smov 128   ;;  %s906_s10 = smov 8  }
  0x29   : > { %755 = dma.hbm_to_vmem [thread:$0]  (!%p987_p12), %s1086_s1, 3456, %s129_s26, [#allocation3], %s905_s9, %s905_s9, %s906_s10  }
  0x2a   : > { %p1096_p13 = scmp.ne.s32.totalorder %s1094_s24, 0 }
  0x2b   : > { %p1097_p1 = scmp.eq.s32.totalorder (!%p1096_p13), %s951_s16, 0 }
  0x2c   : > { %155 = sbr.rel (%p1096_p13) target bundleno = 353 (0x161), region = 32 }
  0x33   : > { %881 = dma.done.wait (%p1097_p1), [#allocation3], 3456   ;;  %p1098_p0 = pmov %p1097_p1 }
  0x34   : > { %p179_p5 = scmp.lt.s32.totalorder %s951_s16, 1  ;;  %v186_v0 = vld [vmem:[#allocation2] sm:$0xff]  ;;  %v187_v1 = vld [vmem:[#allocation2 + $0x8] sm:$0xff]  ;;  %v188_v2 = vld [vmem:[#allocation2 + $0x10] sm:$0xff]  ;;  %vm207_vm0 = vcmask 588800   ;;  %s176_s29 = sand.u32 1, %s894_s13  }
  0x35   : > { %883 = vsyncadd (%p1098_p0), [#allocation3], 4294963840  ;;  %v709_v3 = vpack.c.bf16 %v187_v1, %v186_v0  ;;  %v189_v4 = vld [vmem:[#allocation2 + $0x18] sm:$0xff]  ;;  %v190_v6 = vld [vmem:[#allocation2 + $0x20] sm:$0xff]  ;;  %s582_s30 = sshll.u32 %s176_s29, 4  ;;  %s596_s6 = sshll.u32 %s951_s16, 8 }
  0x36   : > { %s180_s19 = scalar_select %p179_p5, %s951_s16, 1  ;;  %v713_v5 = vpack.c.bf16 %v189_v4, %v188_v2  ;;  %v191_v7 = vld [vmem:[#allocation2 + $0x28] sm:$0xff]  ;;  %v199_v9 = vld [vmem:[#allocation2 + $0x50] sm:$0xff]  ;;  %v200_v14 = vld [vmem:[#allocation2 + $0x58] sm:$0xff] }
  0x37   : > { %710 = vmatprep.subr.bf16.mxu0 %v709_v3  ;;  %v198_v8 = vld [vmem:[#allocation2 + $0x48] sm:$0xff]  ;;  %v717_v12 = vpack.c.bf16 %v191_v7, %v190_v6  ;;  %v192_v13 = vld [vmem:[#allocation2 + $0x30] sm:$0xff]  ;;  %v201_v15 = vld [vmem:[#allocation2 + $0x60] sm:$0xff]  ;;  %s178_s4 = scalar_lea.vmem [#allocation5], %s582_s30  ;;  %s1042_s9 = scalar_lea.hbm %s1088_s3, %s596_s6 }
  0x38   : > { %s745_s20 = smul.u32 24, %s180_s19  ;;  %712 = vmatpush3.bf16.msra.mxu0 %v709_v3  ;;  %v693_v11 = vpack.c.bf16 %v199_v9, %v198_v8  ;;  %v193_v16 = vld [vmem:[#allocation2 + $0x38] sm:$0xff]  ;;  %v697_v17 = vpack.c.bf16 %v201_v15, %v200_v14  ;;  %v202_v18 = vld [vmem:[#allocation2 + $0x68] sm:$0xff]  ;;  %v203_v19 = vld [vmem:[#allocation2 + $0x70] sm:$0xff]  ;;  %s502_s5 = sshll.u32 %s178_s4, 4  ;;  %s1037_s5 = int_to_ptr.vmem [resolvable:$true] %s502_s5 }
  0x39   : > { %714 = vmatprep.subr.bf16.mxu0 %v713_v5  ;;  %v701_v20 = vpack.c.bf16 %v203_v19, %v202_v18  ;;  %v721_v21 = vpack.c.bf16 %v193_v16, %v192_v13  ;;  %v204_v22 = vld [vmem:[#allocation2 + $0x78] sm:$0xff]  ;;  %v205_v23 = vld [vmem:[#allocation2 + $0x80] sm:$0xff]  ;;  %v373_v27 = vld [vmem:[#allocation2 + $0x90] sm:$0xff]  ;;  %s1044_s10 = scalar_lea.sflag [#allocation4], %s176_s29  ;;  %s836_s11 = scalar_lea.vmem %s1037_s5, 256 }
  0x3a   : > { %s1018_s26 = scalar_lea.vmem %s1085_s0, %s745_s20  ;;  %694 = vmatprep.subr.bf16.mxu1 %v693_v11  ;;  %v705_v25 = vpack.c.bf16 %v205_v23, %v204_v22  ;;  %v194_v26 = vld [vmem:[#allocation2 + $0x40] sm:$0xff]  ;;  %v374_v28 = vld [vmem:[#allocation2 + $0x98] sm:$0xff]  ;;  %v376_v30 = vld [vmem:[#allocation2 + $0xa8] sm:$0xff]  ;;  %p837_p6 = scmp.ne.s32.totalorder %s1037_s5, %s836_s11 }
  0x3b   : > { %v184_v10 = vld [vmem:[%s1018_s26] sm:$0xff]  ;;  %696 = vmatpush3.bf16.msra.mxu1 %v693_v11  ;;  %v375_v29 = vld [vmem:[#allocation2 + $0xa0] sm:$0xff]  ;;  %v725_v31 = vpack.c.bf16 %v374_v28, %v373_v27  ;;  %v206_v32 = vld [vmem:[#allocation2 + $0x88] sm:$0xff]  ;;  %p1099_p9 = scmp.ne.s32.totalorder %s1092_s22, 0  ;;  %s907_s16 = smov [#allocation5]  }
  0x3c   : > { %669 = vmatprep.mubr.msk.f32.mxu0 %vm207_vm0, %v184_v10  ;;  %716 = vmatpush3.bf16.msra.mxu0 %v713_v5  ;;  %v195_v24 = vld [vmem:[%s1018_s26 + $0x1] sm:$0xff]  ;;  %v729_v34 = vpack.c.bf16 %v376_v30, %v375_v29  ;;  %v196_v38 = vld [vmem:[%s1018_s26 + $0x9] sm:$0xff]  ;;  %v380_v41 = vld [vmem:[#allocation2 + $0xc8] sm:$0xff]  ;;  %s840_s17 = sshll.u32 %s907_s16, 4  ;;  %s841_s17 = int_to_ptr.vmem [resolvable:$false] %s840_s17 }
  0x3d   : > { %698 = vmatprep.subr.bf16.mxu1 %v697_v17  ;;  %718 = vmatprep.subr.bf16.mxu0 %v717_v12  ;;  %v185_v33 = vld [vmem:[%s1018_s26 + $0x8] sm:$0xff]  ;;  %v377_v36 = vld [vmem:[#allocation2 + $0xb0] sm:$0xff]  ;;  %v379_v40 = vld [vmem:[#allocation2 + $0xc0] sm:$0xff]  ;;  %p838_p10 = pnand %p837_p6, %p1099_p9  ;;  %s842_s19 = scalar_lea.vmem %s841_s17, 512 }
  0x3e   : > { %648 = vmatprep.mubr.msk.f32.mxu1 %vm207_vm0, %v195_v24  ;;  %v370_v35 = vld [vmem:[%s1018_s26 + $0x2] sm:$0xff]  ;;  %v737_v42 = vpack.c.bf16 %v380_v41, %v379_v40  ;;  %v371_v44 = vld [vmem:[%s1018_s26 + $0xa] sm:$0xff]  ;;  %v590_v48 = vld [vmem:[%s1087_s2] ss:$0 sm:$0xff]  ;;  %p843_p2 = scmp.lt.s32.totalorder %s1037_s5, %s841_s17  ;;  %p844_p3 = scmp.lt.s32.totalorder %s842_s19, %s836_s11 }
  0x3f   : > { %700 = vmatpush3.bf16.msra.mxu1 %v697_v17  ;;  %v378_v37 = vld [vmem:[#allocation2 + $0xb8] sm:$0xff]  ;;  %v381_v43 = vld [vmem:[#allocation2 + $0xd0] sm:$0xff]  ;;  %p839_p12 = pneg %p838_p10 }
  0x40   : > { %720 = vmatpush3.bf16.msra.mxu0 %v717_v12  ;;  %702 = vmatprep.subr.bf16.mxu1 %v701_v20  ;;  %v733_v39 = vpack.c.bf16 %v378_v37, %v377_v36  ;;  %p845_p4 = por %p844_p3, %p843_p2 }
  0x41   : > { %722 = vmatprep.subr.bf16.mxu0 %v721_v21 }
  0x42   : > { %p846_p7 = pnand %p845_p4, %p839_p12 }
  0x43   : > { %704 = vmatpush3.bf16.msra.mxu1 %v701_v20 }
  0x44   : > { %724 = vmatpush3.bf16.msra.mxu0 %v721_v21  ;;  %706 = vmatprep.subr.bf16.mxu1 %v705_v25 }
  0x45   : > { %667 = vmatprep.subr.mxu0 %v194_v26 }
  0x47   : > { %708 = vmatpush3.bf16.msra.mxu1 %v705_v25 }
  0x48   : > { %668 = vmatpush3.msra.mxu0 %v194_v26  ;;  %646 = vmatprep.subr.mxu1 %v206_v32 }
  0x49   : > { %726 = vmatprep.subr.bf16.mxu0 %v725_v31  ;;  %670 = vmatmul.mubr.msk.f32.vlgmr.msra.gmra.mrb[0].mxu0 %vm207_vm0, %v185_v33 }
  0x4a   : > { %728 = vmatpush3.bf16.msra.mxu0 %v725_v31  ;;  %690 = vmatprep.mubr.msk.f32.mxu0 %vm207_vm0, %v370_v35 }
  0x4b   : > { %730 = vmatprep.subr.bf16.mxu0 %v729_v34  ;;  %647 = vmatpush3.msra.mxu1 %v206_v32 }
  0x4c   : > { %649 = vmatmul.mubr.msk.f32.vlgmr.msra.gmra.mrb[0].mxu1 %vm207_vm0, %v196_v38 }
  0x4e   : > { %732 = vmatpush3.bf16.msra.mxu0 %v729_v34 }
  0x4f   : > { %734 = vmatprep.subr.bf16.mxu0 %v733_v39 }
  0x52   : > { %736 = vmatpush3.bf16.msra.mxu0 %v733_v39 }
  0x53   : > { %738 = vmatprep.subr.bf16.mxu0 %v737_v42 }
  0x56   : > { %740 = vmatpush3.bf16.msra.mxu0 %v737_v42 }
  0x57   : > { %688 = vmatprep.subr.mxu0 %v381_v43 }
  0x5a   : > { %689 = vmatpush3.msra.mxu0 %v381_v43 }
  0x5b   : > { %691 = vmatmul.mubr.msk.f32.vlgmr.msra.gmra.mrb[0].mxu0 %vm207_vm0, %v371_v44 }
 0x11f   : > { %v650_v45 = vpop.f32.mrb[0].mxu1 }
 0x120   : > { %v280_v46 = vpop.f32.mrb[1].mxu1 }
 0x12e   : > { %v692_v47 = vpop.f32.mrb[0].mxu0 }
 0x12f   : > { %v741_v49 = vadd.f32 %v692_v47, %v650_v45  ;;  %v454_v50 = vpop.f32.mrb[1].mxu0 }
 0x130   : > { %v742_v51 = vadd.f32 %v454_v50, %v280_v46 }
 0x131   : > { %v473_v52 = vadd.f32 %v741_v49, %v590_v48 }
 0x132   : > { %v472_v53 = vadd.f32 %v742_v51, %v590_v48 }
 0x133   : > { %v475_v54 = vsub.f32 0.0, %v473_v52 }
 0x134   : > { %v474_v55 = vsub.f32 0.0, %v472_v53 }
 0x135   : > { %v478_v56 = vmul.f32 1.442695, %v475_v54 }
 0x136   : > { %v476_v57 = vmul.f32 1.442695, %v474_v55 }
 0x137   : > { %800 = vpow2.f32 %v478_v56 }
 0x138   : > { %802 = vpow2.f32 %v476_v57 }
 0x141   : > { %v801_v58 = vpop.eup %800 }
 0x142   : > { %v803_v59 = vpop.eup %802  ;;  %v481_v60 = vadd.f32 1.0, %v801_v58 }
 0x143   : > { %v480_v61 = vadd.f32 1.0, %v803_v59 }
 0x144   : > { %804 = vrcp.f32 %v481_v60 }
 0x145   : > { %806 = vrcp.f32 %v480_v61 }
 0x14e   : > { %v805_v62 = vpop.eup %804 }
 0x14f   : > { %v807_v63 = vpop.eup %806  ;;  %v485_v0 = vmul.f32 %v805_v62, %v473_v52 }
 0x150   : > { %v484_v1 = vmul.f32 %v807_v63, %v472_v53 }
 0x151   : > { %487 = vst [vmem:[%s178_s4 + $0x8] sm:$0xff] %v485_v0 }
 0x152   : > { %486 = vst [vmem:[%s178_s4] sm:$0xff] %v484_v1 }
 0x153   : > { %849 = shalt.err (!%p846_p7)
}
 0x154   : > { %s850_s20 = scalar_lea.hbm %s1042_s9, 256  ;;  %s854_s26 = scalar_lea.hbm %s1088_s3, 512 }
 0x155   : > { %p851_p8 = scmp.ne.s32.totalorder %s1042_s9, %s850_s20  ;;  %p855_p1 = scmp.lt.u32.totalorder %s1042_s9, %s1088_s3 }
 0x156   : > { %p856_p0 = scmp.lt.u32.totalorder %s854_s26, %s850_s20  ;;  %p858_p6 = scmp.lt.u32.totalorder %s850_s20, %s1042_s9 }
 0x157   : > { %p852_p11 = pnand %p851_p8, %p1099_p9 }
 0x158   : > { %p857_p5 = por %p856_p0, %p855_p1 }
 0x159   : > { %p853_p13 = pneg %p852_p11 }
 0x15a   : > { %p859_p10 = por %p858_p6, %p857_p5 }
 0x15c   : > { %p860_p12 = pnand %p859_p10, %p853_p13 }
 0x15e   : > { %863 = shalt.err (!%p860_p12)
}
 0x15f   : > { %s908_s29 = smov 128   ;;  %s909_s30 = smov 8  }
 0x160   : > { %750 = dma.vmem_to_hbm [thread:$0]  (%p1099_p9), %s1037_s5, 256, %s1042_s9, %s1044_s10, %s908_s29, %s908_s29, %s909_s30  }
 0x161 PF: > { %p762_p2 = scmp.ge.s32.totalorder %s902_s15, 2  ;;  %s517_s4 = sand.u32 1, %s890_s12  }
 0x162   : > { %p1100_p3 = scmp.ne.s32.totalorder %s1093_s23, 0  ;;  %s518_s6 = scalar_lea.sflag [#allocation4], %s517_s4 }
 0x164   : > { %p757_p4 = pnand %p762_p2, %p1100_p3 }
 0x166   : > { %885 = dma.done.wait (!%p757_p4), %s518_s6, 256  }
 0x167   : > { %887 = vsyncadd (!%p757_p4), %s518_s6, 4294967040  ;;  %p14_p7 = scmp.ge.s32.totalorder %s955_s18, 4   ;;  %s1101_s12 = smov %s894_s13 }
 0x168   : > { %s1102_s13 = smov %s898_s14  ;;  %s1103_s14 = smov %s966_s21 }
 0x169   : > { %s1104_s15 = smov %s955_s18  ;;  %16 = sbr.rel (!%p14_p7) target bundleno = 4 (0x4), region = 74 }
 0x170   :  { %523 = vsyncpa [#allocation3], 1 }
 0x171   :  { %525 = vsyncpa [#allocation3 + $0x1], 1 }
 0x172   :  { %526 = vsyncpa [#allocation4], 1 }
 0x173   :  { %528 = vsyncpa [#allocation4 + $0x1], 1 }

</bundles_post_ra>
